<compile_context>
chip_gen: v5e
topology: v5e:2x2
jax: 0.10.0
libtpu: 0.0.40
codegen_flags: <defaults>
</compile_context>

<pallas_src>
import math

import jax
import jax.numpy as jnp
from jax import lax
from jax.experimental import pallas as pl
from jax.experimental.pallas import tpu as pltpu


def _round_up(x: int, m: int) -> int:
    return (x + m - 1) // m * m


def _cdiv(a: int, b: int) -> int:
    return (a + b - 1) // b


def _gaussian_encoding_kernel(v_ref, bt_ref, o_ref):
    # v_ref : (tm, D)   row tile of the input
    # bt_ref: (D, te)   pre-transposed weights with 2*pi already folded in
    # o_ref : (tm, te)  one lane-dense output block (cos half or sin half)
    vp = jnp.dot(v_ref[...], bt_ref[...],
                 preferred_element_type=jnp.float32,
                 precision=lax.Precision.HIGHEST)
    half = pl.program_id(1)

    @pl.when(half == 0)
    def _():
        o_ref[...] = jnp.cos(vp).astype(o_ref.dtype)

    @pl.when(half == 1)
    def _():
        o_ref[...] = jnp.sin(vp).astype(o_ref.dtype)
    # TODO(synk): if a bundle dump shows VALU saturated (likely v7x + bf16
    # output), hand-fuse sincos with a shared range reduction here.


def _vmem_budget():
    """Generation-aware VMEM budget / compiler limit (bytes) and row-tile cap."""
    try:
        cap = int(pltpu.get_tpu_info().vmem_capacity_bytes)
    except Exception:  # interpret mode / lookup failure: assume smallest (v7x)
        cap = 64 * 1024 * 1024
    budget = int(cap * 0.65)      # pipeline buffers + live values
    limit = int(cap * 0.80)       # scoped-VMEM limit handed to the compiler
    tm_cap = 2048 if cap >= 128 * 1024 * 1024 else 1024
    return budget, limit, tm_cap


def _choose_tiles(n_rows, d, e_pad, in_itemsize, out_itemsize, sublane,
                  vmem_budget_bytes, tm_cap):
    """Pick (tm, te): row tile and per-half column tile (te | e_pad, te % 128 == 0)."""

    def step_bytes(tm, te):
        v_bufs = 2 * tm * d * in_itemsize        # double-buffered input rows
        b_bufs = 2 * d * te * 4                  # double-buffered weights
        o_bufs = 2 * tm * te * out_itemsize      # double-buffered output block
        live = tm * te * (4 + out_itemsize)      # f32 vp + cast result
        return v_bufs + b_bufs + o_bufs + live

    # Column-tile candidates: multiples of 128 that divide e_pad, widest first.
    te_candidates = [t for t in range(e_pad, 0, -128) if e_pad % t == 0]

    # Widest te that still allows a >=512 row tile within the budget
    # (falls back to 128 for very large encoded_size on v7x).
    te = te_candidates[-1]
    for cand in te_candidates:
        if step_bytes(min(512, tm_cap), cand) <= vmem_budget_bytes:
            te = cand
            break

    # Grow the row tile as large as the budget / cap allow.
    tm = tm_cap
    while tm > sublane and step_bytes(tm, te) > vmem_budget_bytes:
        tm //= 2
    tm = max(sublane, tm)

    # Keep >= 2 row tiles when N allows (the row axis is "parallel" and is
    # sharded across v7x's two TensorCores) ...
    half_rows = max(sublane, _round_up(_cdiv(n_rows, 2), sublane))
    tm = min(tm, half_rows)

    # ... and nudge towards an even row-tile count so the cores stay balanced.
    r = _cdiv(n_rows, tm)
    if r > 1 and r % 2 == 1:
        tm_alt = max(sublane, _round_up(_cdiv(n_rows, r + 1), sublane))
        if _cdiv(n_rows, tm_alt) % 2 == 0:
            tm = tm_alt
    return tm, te


def prepare_fourier_weights(b: jax.Array):
    """(E, D) gaussian matrix -> ((D, E_pad) transposed + 2*pi-scaled, E)."""
    e, d = b.shape
    e_pad = _round_up(e, 128)
    bt = (2.0 * jnp.pi * b.astype(jnp.float32)).T     # (D, E), one-time transform
    if e_pad != e:
        bt = jnp.pad(bt, ((0, 0), (0, e_pad - e)))
    return bt, e


def gaussian_encoding_pallas(v, bt_scaled, encoded_size, *, tm=None, te=None,
                             out_dtype=None):
    """v: (..., D), bt_scaled: (D, E_pad) preprocessed -> (..., 2*encoded_size).

    out_dtype defaults to v.dtype (matches the PyTorch module).  Output bytes
    dominate HBM traffic, so out_dtype=jnp.bfloat16 is the recommended fast
    path whenever downstream consumers tolerate it.
    """
    orig_shape = v.shape
    d = orig_shape[-1]
    db, e_pad = bt_scaled.shape
    assert d == db, "feature-dim mismatch"
    assert e_pad % 128 == 0, "E must be padded to a multiple of 128"

    n = math.prod(orig_shape[:-1])
    v2 = v.reshape(n, d)

    out_dtype = jnp.dtype(out_dtype or v.dtype)
    in_itemsize = jnp.dtype(v.dtype).itemsize
    out_itemsize = out_dtype.itemsize
    # f32 min sublane tile is 8; sub-32-bit dtypes pack 2 rows per sublane.
    sublane = 8 if min(in_itemsize, out_itemsize) >= 4 else 16

    budget, vmem_limit, tm_cap = _vmem_budget()
    tm_auto, te_auto = _choose_tiles(n, d, e_pad, in_itemsize, out_itemsize,
                                     sublane, budget, tm_cap)
    tm = tm_auto if tm is None else max(sublane, _round_up(tm, sublane))
    te = te_auto if te is None else te
    assert te % 128 == 0 and e_pad % te == 0, \
        "te must be a multiple of 128 and divide E_pad"

    n_row_tiles = _cdiv(n, tm)          # ragged last row block is masked by Pallas
    n_e_tiles = e_pad // te

    out = pl.pallas_call(
        _gaussian_encoding_kernel,
        out_shape=jax.ShapeDtypeStruct((n, 2 * e_pad), out_dtype),
        grid_spec=pltpu.PrefetchScalarGridSpec(
            num_scalar_prefetch=0,
            grid=(n_row_tiles, 2, n_e_tiles),
            in_specs=[
                pl.BlockSpec((tm, d), lambda i, h, j: (i, 0)),   # v row tile
                pl.BlockSpec((d, te), lambda i, h, j: (0, j)),   # weight cols
            ],
            out_specs=pl.BlockSpec(
                (tm, te), lambda i, h, j: (i, h * n_e_tiles + j)),
        ),
        compiler_params=pltpu.CompilerParams(
            dimension_semantics=("parallel", "parallel", "parallel"),
            vmem_limit_bytes=vmem_limit,
        ),
    )(v2, bt_scaled)

    e = encoded_size
    if e_pad != e:
        # TODO(synk): this slice+concat is a full extra HBM pass over the
        # output; consumers that can use the padded [cos | sin] layout
        # (cos at [:, :e], sin at [:, e_pad:e_pad+e]) should take `out` as-is.
        out = jnp.concatenate([out[:, :e], out[:, e_pad:e_pad + e]], axis=-1)
    return out.reshape(*orig_shape[:-1], 2 * e)


def gaussian_encoding(v: jax.Array, b: jax.Array, **kwargs) -> jax.Array:
    """Functional API matching the PyTorch helper: v (..., D), b (E, D).

    Re-preprocesses `b` on every call; prefer the GaussianEncoding class
    (which caches the preprocessed weights) in hot loops.
    """
    bt_scaled, e = prepare_fourier_weights(b)
    return gaussian_encoding_pallas(v, bt_scaled, e, **kwargs)


class GaussianEncoding:
    """JAX/Pallas port of the PyTorch GaussianEncoding module (frozen params)."""

    def __init__(self, sigma: float, input_size: int, encoded_size: int, key):
        # Frozen parameter `batch` (encoded_size, input_size) = randn * sigma.
        self.batch = jax.random.normal(
            key, (encoded_size, input_size), dtype=jnp.float32) * sigma
        # One-time preprocessing of the frozen parameter (transpose, 2*pi fold,
        # lane padding) so nothing is re-done per call or per grid step.
        self._bt_scaled, self._encoded_size = prepare_fourier_weights(self.batch)

    def __call__(self, v: jax.Array, **kwargs) -> jax.Array:
        return gaussian_encoding_pallas(
            v, self._bt_scaled, self._encoded_size, **kwargs)


if __name__ == "__main__":
    key = jax.random.PRNGKey(0)
    k_b, k_v = jax.random.split(key)

    N, D, E = 16, 32, 128   # batch rows, input_size, encoded_size
    sigma = 1.5

    enc = GaussianEncoding(sigma, input_size=D, encoded_size=E, key=k_b)
    v = jax.random.normal(k_v, (N, D), dtype=jnp.float32)
    out = jax.block_until_ready(enc(v))

    # Also exercise a ragged (non tm-divisible) batch through the cdiv grid.
    v_odd = jax.random.normal(k_v, (11, D), dtype=jnp.float32)
    out_odd = jax.block_until_ready(enc(v_odd))

    # Reference check in plain JAX.
    def ref_fn(x):
        vp = 2.0 * jnp.pi * (x @ enc.batch.T)
        return jnp.concatenate([jnp.cos(vp), jnp.sin(vp)], axis=-1)

    assert out.shape == (N, 2 * E)
    assert jnp.max(jnp.abs(out - ref_fn(v))) < 5e-4
    assert out_odd.shape == (11, 2 * E)
    assert jnp.max(jnp.abs(out_odd - ref_fn(v_odd))) < 5e-4

    print("KERNEL_OK")
</pallas_src>

<mosaic_0001>
module attributes {stable_mosaic.version = 11 : i64} {
  func.func @_gaussian_encoding_kernel(%arg0: i32, %arg1: i32, %arg2: i32, %arg3: memref<8x32xf32, #tpu.memory_space<vmem>>, %arg4: memref<32x128xf32, #tpu.memory_space<vmem>>, %arg5: memref<8x128xf32, #tpu.memory_space<vmem>>) attributes {dimension_semantics = [#tpu.dimension_semantics<parallel>, #tpu.dimension_semantics<parallel>, #tpu.dimension_semantics<parallel>], iteration_bounds = array<i64: 2, 2, 1>, scalar_prefetch = 0 : i64, scratch_operands = 0 : i64, tpu.core_type = #tpu.core_type<tc>, window_params = [{transform_indices = @transform_0, window_bounds = array<i64: 8, 32>}, {transform_indices = @transform_1, window_bounds = array<i64: 32, 128>}, {transform_indices = @transform_2, window_bounds = array<i64: 8, 128>}]} {
    %c0 = arith.constant 0 : index
    %c0_0 = arith.constant 0 : index
    %0 = vector.load %arg3[%c0, %c0_0] : memref<8x32xf32, #tpu.memory_space<vmem>>, vector<8x32xf32>
    %c0_1 = arith.constant 0 : index
    %c0_2 = arith.constant 0 : index
    %1 = vector.load %arg4[%c0_1, %c0_2] : memref<32x128xf32, #tpu.memory_space<vmem>>, vector<32x128xf32>
    %cst = arith.constant dense<0.000000e+00> : vector<8x128xf32>
    %2 = tpu.matmul %0, %1, %cst {dimension_numbers = #tpu.dot_dimension_numbers<[1], [0], [0], [1], [0, 0, 1, 1], [], []>, precision = #tpu.contract_precision<fp32>} : vector<8x32xf32>, vector<32x128xf32>, vector<8x128xf32> -> vector<8x128xf32>
    %c0_i32 = arith.constant 0 : i32
    %3 = arith.cmpi eq, %arg1, %c0_i32 : i32
    %4 = arith.extui %3 : i1 to i32
    %c0_i32_3 = arith.constant 0 : i32
    %5 = arith.cmpi ne, %4, %c0_i32_3 : i32
    scf.if %5 {
      %9 = math.cos %2 : vector<8x128xf32>
      %c0_5 = arith.constant 0 : index
      %c0_6 = arith.constant 0 : index
      %10 = vector.load %arg5[%c0_5, %c0_6] : memref<8x128xf32, #tpu.memory_space<vmem>>, vector<8x128xf32>
      tpu.vector_store %arg5[%c0_5, %c0_6], %9 {strides = array<i32>} : memref<8x128xf32, #tpu.memory_space<vmem>>, vector<8x128xf32>,
    } else {
    }
    %c1_i32 = arith.constant 1 : i32
    %6 = arith.cmpi eq, %arg1, %c1_i32 : i32
    %7 = arith.extui %6 : i1 to i32
    %c0_i32_4 = arith.constant 0 : i32
    %8 = arith.cmpi ne, %7, %c0_i32_4 : i32
    scf.if %8 {
      %9 = math.sin %2 : vector<8x128xf32>
      %c0_5 = arith.constant 0 : index
      %c0_6 = arith.constant 0 : index
      %10 = vector.load %arg5[%c0_5, %c0_6] : memref<8x128xf32, #tpu.memory_space<vmem>>, vector<8x128xf32>
      tpu.vector_store %arg5[%c0_5, %c0_6], %9 {strides = array<i32>} : memref<8x128xf32, #tpu.memory_space<vmem>>, vector<8x128xf32>,
    } else {
    }
    return
  }
  func.func @transform_0(%arg0: i32, %arg1: i32, %arg2: i32) -> (i32, i32) {
    %c0_i32 = arith.constant 0 : i32
    %c0_i32_0 = arith.constant 0 : i32
    return %arg0, %c0_i32 : i32, i32
  }
  func.func @transform_1(%arg0: i32, %arg1: i32, %arg2: i32) -> (i32, i32) {
    %c0_i32 = arith.constant 0 : i32
    %c0_i32_0 = arith.constant 0 : i32
    return %c0_i32, %arg2 : i32, i32
  }
  func.func @transform_2(%arg0: i32, %arg1: i32, %arg2: i32) -> (i32, i32) {
    %c1_i32 = arith.constant 1 : i32
    %0 = arith.muli %arg1, %c1_i32 : i32
    %1 = arith.addi %0, %arg2 : i32
    %c0_i32 = arith.constant 0 : i32
    return %arg0, %1 : i32, i32
  }
}

</mosaic_0001>

<bundles_post_ra>
// kernel: tpu_custom_call.1
= control target key start
LH: loop header
LB: loop body
LE: loop exit
PB: predicated region body
PF: predicated region fallthrough
CT: control target
= control target key end

     0   :  { %s1523_s0 = inlined_call_operand.hbm [shape: f32[16,32], index: 0, kind: input, shape index: {}]   ;;  %s1524_s1 = inlined_call_operand.hbm [shape: f32[32,128], index: 1, kind: input, shape index: {}]   ;;  %s1525_s2 = inlined_call_operand.hbm [shape: f32[16,256], index: 2, kind: output, shape index: {}]  }
   0x1   :  { %1530 = sst [smem:[#allocation16_spill]] %s1524_s1 }
   0x2   :  { %7 = vsyncpa [#allocation3], 0 }
   0x3   :  { %9 = vsyncpa [#allocation3 + $0x1], 0 }
   0x4   :  { %10 = vsyncpa [#allocation6], 0 }
   0x5   :  { %11 = vsyncpa [#allocation4], 0 }
   0x6   :  { %13 = vsyncpa [#allocation4 + $0x1], 0  ;;  %s1213_s9 = smov 0   ;;  %s1215_s10 = smov 0  }
   0x7   :  { %s1217_s11 = smov 0   ;;  %s1219_s12 = smov 0  }
   0x8   :  { %s1221_s13 = smov 0   ;;  %s1223_s14 = smov 0  }
   0x9   :  { %s1225_s15 = smov 0   ;;  %s1227_s16 = smov 0  }
   0xa   :  { %s1229_s17 = smov 0   ;;  %s1231_s18 = smov 0  }
   0xb   :  { %s1233_s19 = smov 0  }
   0xc LB: > { %1531 = sst [smem:[#allocation11_spill]] %s1171_s17  ;;  %s840_s20 = sadd.s32 4294967295, %s1179_s19   ;;  %s1179_s19 = sphi %s1233_s19, %s19_s19   ;;  %s1175_s18 = sphi %s1231_s18, %s1550_s18   ;;  %s1171_s17 = sphi %s1229_s17, %s1549_s17   ;;  %s1167_s16 = sphi %s1227_s16, %s1548_s16   ;;  %s1163_s15 = sphi %s1225_s15, %s1547_s15   ;;  %s1159_s14 = sphi %s1223_s14, %s1556_s14   ;;  %s1155_s13 = sphi %s1221_s13, %s1555_s13   ;;  %s1151_s12 = sphi %s1219_s12, %s1554_s12   ;;  %s1147_s11 = sphi %s1217_s11, %s1553_s11   ;;  %s1143_s10 = sphi %s1215_s10, %s1552_s10   ;;  %s1139_s9 = sphi %s1213_s9, %s1551_s9  }
   0xd   : > { %1532 = sst [smem:[#allocation12_spill]] %s1175_s18  ;;  %p842_p0 = scmp.ge.s32.totalorder %s1179_s19, 1 }
   0xe   : > { %p1270_p1 = scmp.eq.s32.totalorder %s840_s20, 0  ;;  %p1274_p2 = scmp.eq.s32.totalorder %s840_s20, 3 }
   0xf   : > { %p125_p3 = scmp.lt.s32.totalorder %s1179_s19, 5  ;;  %s1535_s1 = sld [smem:[#allocation16_spill]] }
  0x10   : > { %s1181_s27 = smov [#allocation5]   ;;  %s1182_s29 = smov 128  }
  0x11   : > { %p1282_p4 = pnand %p842_p0, %p125_p3  ;;  %s140_s28 = sshll.u32 %s1181_s27, 4  ;;  %s141_s28 = int_to_ptr.vmem [resolvable:$true] %s140_s28 }
  0x12   : > { %s1183_s30 = smov 8   ;;  %s841_s3 = sadd.s32 4294967294, %s1179_s19  }
  0x13   : > { %p872_p5 = pneg %p1282_p4  ;;  %s34_s4 = sadd.s32 1, %s1171_s17 }
  0x14   : > { %p36_p7 = scmp.ge.s32.totalorder %s34_s4, 2  ;;  %s38_s5 = sadd.s32 1, %s1175_s18 }
  0x15   : > { %s138_s25 = sshll.u32 %s1535_s1, 4  ;;  %p873_p6 = pnand %p872_p5, %p1270_p1  ;;  %s139_s25 = int_to_ptr.hbm [resolvable:$true] %s138_s25 }
  0x16   : > { %s45_s6 = sadd.s32 1, %s1159_s14  ;;  %p52_p8 = scmp.ne.s32.totalorder %s1159_s14, %s1155_s13 }
  0x17   : > { %875 = dma.hbm_to_vmem [thread:$0]  (!%p873_p6), %s139_s25, 512, %s141_s28, [#allocation6], %s1182_s29, %s1182_s29, %s1183_s30  }
  0x18   : > { %s1558_s4 = smov (%p36_p7, %s34_s4), 0  ;;  %s1560_s5 = smov (!%p36_p7, %s38_s5), %s1175_s18 }
  0x19   : > { %1537 = sst [smem:[#allocation13_spill]] %s1558_s4  ;;  %p53_p9 = scmp.eq.s32.totalorder %s1179_s19, 0 }
  0x1a   : > { %p58_p10 = scmp.ne.s32.totalorder %s1155_s13, %s1151_s12  ;;  %p40_p11 = scmp.ge.s32.totalorder %s1560_s5, 2 }
  0x1b   : > { %s97_s7 = ssub.s32 %s1171_s17, %s1558_s4  ;;  %p1304_p12 = por %p53_p9, %p52_p8 }
  0x1c   : > { %p1310_p13 = por %p1270_p1, %p58_p10  ;;  %s1562_s5 = smov (%p40_p11, %s1560_s5), 0 }
  0x1d   : > { %1540 = sst [smem:[#allocation14_spill]] %s1562_s5  ;;  %s101_s23 = sadd.s32 1, %s1147_s11 }
  0x1e   : > { %p111_p0 = scmp.ne.s32.totalorder %s1147_s11, %s1143_s10  ;;  %s42_s12 = ssub.s32 %s1175_s18, %s1562_s5 }
  0x1f   : > { %p117_p3 = scmp.ne.s32.totalorder %s1143_s10, %s1139_s9  ;;  %p43_p5 = scmp.eq.s32.totalorder %s42_s12, 0 }
  0x20   : > { %s98_s24 = sor.u32 %s97_s7, %s42_s12  ;;  %p1325_p7 = por %p1274_p2, %p111_p0 }
  0x21   : > { %p99_p6 = scmp.eq.s32.totalorder %s98_s24, 0  ;;  %p118_p8 = scmp.eq.s32.totalorder %s841_s3, 3 }
  0x22   : > { %s1330_s27 = scalar_select %p43_p5, %s1159_s14, %s45_s6  }
  0x23   : > { %s1333_s28 = scalar_select %p99_p6, %s1147_s11, %s101_s23  }
  0x24   : > { %1542 = sst [smem:[#allocation15_spill]] %s1330_s27  ;;  %p885_p9 = scmp.lt.s32.totalorder %s1179_s19, 4 }
  0x25   : > { %s154_s29 = sand.u32 1, %s1159_s14   ;;  %s846_s30 = sshll.u32 %s1175_s18, 3 }
  0x26   : > { %p1338_p10 = por %p118_p8, %p117_p3  ;;  %s845_s7 = sshll.u32 %s154_s29, 3 }
  0x27   : > { %s162_s24 = scalar_lea.hbm %s1523_s0, %s846_s30  ;;  %s158_s4 = scalar_lea.vmem [#allocation2], %s845_s7 }
  0x28   : > { %s164_s5 = sshll.u32 %s162_s24, 4  ;;  %s166_s6 = sshll.u32 %s158_s4, 4  ;;  %s165_s5 = int_to_ptr.hbm [resolvable:$true] %s164_s5  ;;  %s167_s6 = int_to_ptr.vmem [resolvable:$true] %s166_s6 }
  0x29   : > { %p877_p2 = pnand %p885_p9, %p1304_p12  ;;  %s155_s3 = scalar_lea.sflag [#allocation3], %s154_s29 }
  0x2a   : > { %175 = sbr.rel (%p1282_p4) target bundleno = 422 (0x1a6), region = 28  ;;  %s177_s23 = sand.u32 (!%p1282_p4), 1, %s1155_s13  }
  0x2b   : > { %879 = dma.hbm_to_vmem [thread:$0]  (!%p877_p2), %s165_s5, 128, %s167_s6, %s155_s3  }
  0x2c   : > { %s848_s18 = sshll.u32 (!%p1282_p4), %s177_s23, 3  ;;  %s178_s17 = scalar_lea.sflag (!%p1282_p4), [#allocation3], %s177_s23 }
  0x2d   : > { %s181_s27 = scalar_lea.vmem (!%p1282_p4), [#allocation2], %s848_s18 }
  0x2f   : > { %1126 = dma.done.wait (%p1310_p13), %s178_s17, 128  }
  0x30   : > { %1128 = vsyncadd (%p1310_p13), %s178_s17, 4294967168 }
  0x31   : > { %1130 = dma.done.wait (%p1270_p1), [#allocation6], 512  }
  0x32   : > { %1132 = vsyncadd (%p1270_p1), [#allocation6], 4294966784  ;;  %s205_s26 = sand.u32 1, %s1143_s10   ;;  %vm214_vm0 = vcmask 261120   ;;  %v213_v0 = vld [vmem:[#allocation5 + $0x18] sm:$0xff]  ;;  %v212_v1 = vld [vmem:[#allocation5 + $0x10] sm:$0xff] }
  0x33   : > { %s1361_s4 = sshll.u32 %s205_s26, 3  ;;  %v211_v2 = vld [vmem:[#allocation5 + $0x8] sm:$0xff]  ;;  %v230_v3 = vand.u32 4294901760, %v213_v0  ;;  %v232_v4 = vand.u32 4294901760, %v212_v1  ;;  %v210_v6 = vld [vmem:[#allocation5] sm:$0xff]  ;;  %v209_v7 = vld [vmem:[%s181_s27] sm:$0xff] }
  0x34   : > { %v234_v5 = vand.u32 4294901760, %v211_v2  ;;  %v236_v8 = vand.u32 4294901760, %v210_v6  ;;  %v216_v9 = vsel %vm214_vm0, %v209_v7, 0  ;;  %s1366_s17 = scalar_lea.vmem [#allocation7], %s1361_s4  ;;  %p851_p1 = scmp.ne.s32.totalorder %s1163_s15, 0 }
  0x35   : > { %v260_v10 = vsub.f32 %v213_v0, %v230_v3  ;;  %231 = vmatpush.msra.mxu0 %v230_v3  ;;  %v266_v11 = vsub.f32 %v212_v1, %v232_v4  ;;  %331 = vmatpush.msra.mxu3 %v230_v3  ;;  %v238_v13 = vand.u32 4294901760, %v216_v9 }
  0x36   : > { %v272_v12 = vsub.f32 %v211_v2, %v234_v5  ;;  %v278_v14 = vsub.f32 %v210_v6, %v236_v8 }
  0x37   : > { %302 = vmatpush.msra.mxu2 %v260_v10  ;;  %233 = vmatpush.msra.mxu0 %v232_v4  ;;  %v261_v15 = vand.u32 4294901760, %v260_v10  ;;  %v267_v16 = vand.u32 4294901760, %v266_v11  ;;  %v239_v17 = vsub.f32 %v216_v9, %v238_v13 }
  0x38   : > { %v273_v18 = vand.u32 4294901760, %v272_v12  ;;  %333 = vmatpush.msra.mxu3 %v232_v4  ;;  %v279_v19 = vand.u32 4294901760, %v278_v14 }
  0x39   : > { %305 = vmatpush.msra.mxu2 %v266_v11  ;;  %v262_v20 = vsub.f32 %v260_v10, %v261_v15  ;;  %235 = vmatpush.msra.mxu0 %v234_v5  ;;  %v268_v21 = vsub.f32 %v266_v11, %v267_v16  ;;  %v240_v23 = vand.u32 4294901760, %v239_v17 }
  0x3a   : > { %v274_v22 = vsub.f32 %v272_v12, %v273_v18  ;;  %335 = vmatpush.msra.mxu3 %v234_v5  ;;  %v280_v27 = vsub.f32 %v278_v14, %v279_v19 }
  0x3b   : > { %v263_v24 = vand.u32 4294901760, %v262_v20  ;;  %308 = vmatpush.msra.mxu2 %v272_v12  ;;  %v269_v25 = vand.u32 4294901760, %v268_v21  ;;  %237 = vmatpush.msra.mxu0 %v236_v8  ;;  %v241_v26 = vsub.f32 %v239_v17, %v240_v23 }
  0x3c   : > { %337 = vmatpush.msra.mxu3 %v236_v8  ;;  %v275_v28 = vand.u32 4294901760, %v274_v22  ;;  %v281_v30 = vand.u32 4294901760, %v280_v27 }
  0x3d   : > { %360 = vmatpush.msrb.mxu0 %v261_v15  ;;  %264 = vmatpush.msra.mxu1 %v263_v24  ;;  %v242_v29 = vand.u32 4294901760, %v241_v26 }
  0x3e   : > { %311 = vmatpush.msra.mxu2 %v278_v14  ;;  %341 = vmatmul.f32.vlgmr.msra.gmra.mxu3 %v240_v23 }
  0x3f   : > { %314 = vmatmul.f32.vlgmr.msra.gmra.mxu2 %v239_v17  ;;  %270 = vmatpush.msra.mxu1 %v269_v25 }
  0x40   : > { %243 = vmatmul.f32.vlgmr.msra.gmra.mxu0 %v242_v29 }
  0x41   : > { %364 = vmatpush.msrb.mxu0 %v267_v16  ;;  %276 = vmatpush.msra.mxu1 %v275_v28 }
  0x43   : > { %368 = vmatpush.msrb.mxu0 %v273_v18  ;;  %282 = vmatpush.msra.mxu1 %v281_v30 }
  0x44   : > { %284 = vmatmul.f32.vlgmr.msra.gmra.mxu1 %v238_v13 }
  0x45   : > { %372 = vmatpush.msrb.mxu0 %v279_v19  ;;  %391 = vmatpush.msrb.mxu1 %v230_v3 }
  0x47   : > { %393 = vmatpush.msrb.mxu1 %v232_v4 }
  0x48   : > { %374 = vmatmul.f32.vlgmr.msrb.gmra.mxu0 %v238_v13 }
  0x49   : > { %395 = vmatpush.msrb.mxu1 %v234_v5 }
  0x4b   : > { %397 = vmatpush.msrb.mxu1 %v236_v8 }
  0x4c   : > { %399 = vmatmul.f32.vlgmr.msrb.gmra.mxu1 %v238_v13 }
  0xbd   : > { %v244_v31 = vpop.f32.mrf.mxu0 }
  0xc1   : > { %v285_v32 = vpop.f32.mrf.mxu1  ;;  %v342_v35 = vpop.f32.mrf.mxu3 }
  0xc2   : > { %v315_v33 = vpop.f32.mrf.mxu2  ;;  %v286_v34 = vadd.f32 %v285_v32, %v244_v31 }
  0xc4   : > { %v316_v36 = vadd.f32 %v315_v33, %v286_v34 }
  0xc5   : > { %v375_v37 = vpop.f32.mrf.mxu0 }
  0xc6   : > { %v343_v38 = vadd.f32 %v342_v35, %v316_v36  ;;  %406 = sbr.rel (%p851_p1) target bundleno = 301 (0x12d), region = 40 }
  0xc8   : > { %v376_v39 = vadd.f32 %v375_v37, %v343_v38 }
  0xc9   : > { %v400_v40 = vpop.f32.mrf.mxu1 }
  0xca   : > { %v1363_v41 = vadd.f32 %v400_v40, %v376_v39 }
  0xcb   : > { %v1184_v53 = vmov 683565275   ;;  %v1185_v55 = vmov 2475754826   ;;  %v1186_v57 = vmov 2131351028  }
  0xcc   : > { %v410_v42 = vand.u32 2139095040, %v1363_v41  ;;  %v407_v44 = vand.u32 2147483647, %v1363_v41  ;;  %v1187_v59 = vmov 2102212464   ;;  %vm409_vm13 = vcmp.lt.s32.totalorder %v1363_v41, 0 }
  0xcd   : > { %v1188_v61 = vmov 920167782   ;;  %v1189_v3 = vmov 1326507024  }
  0xce   : > { %v411_v43 = vshrl.u32 %v410_v42, 23  ;;  %v414_v47 = vand.u32 8388607, %v407_v44  ;;  %v1190_v42 = vmov 0   ;;  %vm1411_vm14 = vcmp.le.f32.partialorder %v407_v44, 0.7853982 }
  0xd0   : > { %v852_v45 = vadd.s32 4294967169, %v411_v43  ;;  %v415_v50 = vor.u32 8388608, %v414_v47 }
  0xd2   : > { %v417_v46 = vadd.s32 1, %v852_v45  ;;  %v1376_v5 = vshll.u32 %v415_v50, 8 }
  0xd4   : > { %vm418_vm1 = vcmp.gt.s32.totalorder %v417_v46, 0  ;;  %v456_v17 = vand.u32 65535, %v1376_v5  ;;  %v457_v18 = vshrl.u32 %v1376_v5, 16 }
  0xd5   : > { %v419_v48 = vsel %vm418_vm1, %v417_v46, 0 }
  0xd6   : > { %v421_v49 = vand.u32 31, %v419_v48  ;;  %v1373_v51 = vshrl.u32 %v419_v48, 5 }
  0xd8   : > { %v422_v52 = vsub.s32 32, %v421_v49  ;;  %v424_v54 = vshll.u32 %v1184_v53, %v421_v49  ;;  %v427_v56 = vshll.u32 %v1185_v55, %v421_v49  ;;  %v430_v58 = vshll.u32 %v1186_v57, %v421_v49 }
  0xd9   : > { %v433_v60 = vshll.u32 %v1187_v59, %v421_v49  ;;  %v436_v62 = vshll.u32 %v1188_v61, %v421_v49  ;;  %vm439_vm2 = vcmp.lt.s32.totalorder %v1373_v51, 1  ;;  %vm442_vm3 = vcmp.lt.s32.totalorder %v1373_v51, 4 }
  0xda   : > { %v425_v63 = vshrl.u32 %v1185_v55, %v422_v52  ;;  %v428_v0 = vshrl.u32 %v1186_v57, %v422_v52  ;;  %v431_v1 = vshrl.u32 %v1187_v59, %v422_v52  ;;  %v434_v2 = vshrl.u32 %v1188_v61, %v422_v52 }
  0xdb   : > { %v437_v4 = vshrl.u32 %v1189_v3, %v422_v52  ;;  %vm441_vm4 = vcmp.lt.s32.totalorder %v1373_v51, 3  ;;  %vm440_vm5 = vcmp.lt.s32.totalorder %v1373_v51, 2  ;;  %v423_v25 = vshrl.u32 %v1184_v53, %v422_v52 }
  0xdc   : > { %v426_v6 = vor.u32 %v425_v63, %v424_v54  ;;  %v429_v7 = vor.u32 %v428_v0, %v427_v56  ;;  %v432_v8 = vor.u32 %v431_v1, %v430_v58  ;;  %v435_v9 = vor.u32 %v434_v2, %v433_v60 }
  0xdd   : > { %v438_v10 = vor.u32 %v437_v4, %v436_v62 }
  0xde   : > { %v447_v11 = vsel %vm439_vm2, %v426_v6, %v429_v7  ;;  %v451_v12 = vsel %vm439_vm2, %v429_v7, %v432_v8  ;;  %v448_v13 = vsel %vm442_vm3, %v435_v9, 920167782  ;;  %v443_v38 = vsel %vm439_vm2, %v423_v25, %v426_v6 }
  0xdf   : > { %v452_v14 = vsel %vm442_vm3, %v438_v10, 1326507024  ;;  %v449_v15 = vsel %vm441_vm4, %v432_v8, %v448_v13  ;;  %v444_v40 = vsel %vm442_vm3, %v432_v8, 2102212464  ;;  %vm550_vm2 = vweird.f32 %v1363_v41 }
  0xe0   : > { %v453_v16 = vsel %vm441_vm4, %v435_v9, %v452_v14  ;;  %v450_v19 = vsel %vm440_vm5, %v447_v11, %v449_v15  ;;  %v445_v53 = vsel %vm441_vm4, %v429_v7, %v444_v40 }
  0xe1   : > { %v454_v20 = vsel %vm440_vm5, %v451_v12, %v453_v16  ;;  %v480_v23 = vand.u32 65535, %v450_v19  ;;  %v481_v24 = vshrl.u32 %v450_v19, 16  ;;  %v446_v61 = vsel %vm440_vm5, %v443_v38, %v445_v53 }
  0xe2   : > { %v458_v21 = vand.u32 65535, %v454_v20  ;;  %v459_v22 = vshrl.u32 %v454_v20, 16  ;;  %v500_v1 = vmul.u32 %v1376_v5, %v446_v61 }
  0xe3   : > { %v482_v29 = vmul.u32 %v480_v23, %v456_v17  ;;  %v483_v30 = vmul.u32 %v481_v24, %v456_v17  ;;  %v484_v31 = vmul.u32 %v480_v23, %v457_v18  ;;  %v485_v35 = vmul.u32 %v481_v24, %v457_v18 }
  0xe4   : > { %v460_v26 = vmul.u32 %v458_v21, %v456_v17  ;;  %v461_v27 = vmul.u32 %v459_v22, %v456_v17  ;;  %v462_v28 = vmul.u32 %v458_v21, %v457_v18  ;;  %v463_v32 = vmul.u32 %v459_v22, %v457_v18 }
  0xe5   : > { %v486_v36 = vshll.u32 %v483_v30, 16  ;;  %v488_v37 = vshll.u32 %v484_v31, 16  ;;  %v487_v50 = vshrl.u32 %v483_v30, 16  ;;  %v489_v57 = vshrl.u32 %v484_v31, 16 }
  0xe6   : > { %v464_v33 = vshll.u32 %v461_v27, 16  ;;  %v466_v34 = vshll.u32 %v462_v28, 16  ;;  %v465_v46 = vshrl.u32 %v461_v27, 16  ;;  %v467_v54 = vshrl.u32 %v462_v28, 16 }
  0xe7   : > { %vm490_vm7 = vc.u32 %v482_v29, %v486_v36  ;;  %v492_v45 = vadd.s32 %v486_v36, %v482_v29 }
  0xe8   : > { %vm468_vm6 = vc.u32 %v460_v26, %v464_v33  ;;  %v470_v39 = vadd.s32 %v464_v33, %v460_v26  ;;  %v491_v48 = vsel %vm490_vm7, 1, %v1190_v42 }
  0xe9   : > { %v469_v43 = vsel %vm468_vm6, 1, %v1190_v42  ;;  %v493_v52 = vadd.s32 %v491_v48, %v485_v35  ;;  %vm494_vm9 = vc.u32 %v492_v45, %v488_v37  ;;  %v496_v60 = vadd.s32 %v492_v45, %v488_v37 }
  0xea   : > { %v471_v47 = vadd.s32 %v469_v43, %v463_v32  ;;  %vm472_vm8 = vc.u32 %v470_v39, %v466_v34  ;;  %v495_v56 = vsel %vm494_vm9, 1, %v1190_v42 }
  0xeb   : > { %v473_v49 = vsel %vm472_vm8, 1, %v1190_v42  ;;  %v497_v58 = vadd.s32 %v495_v56, %v493_v52 }
  0xec   : > { %v475_v55 = vadd.s32 %v473_v49, %v471_v47 }
  0xed   : > { %v498_v62 = vadd.s32 %v497_v58, %v487_v50 }
  0xee   : > { %v476_v59 = vadd.s32 %v475_v55, %v465_v46 }
  0xef   : > { %v499_v0 = vadd.s32 %v498_v62, %v489_v57 }
  0xf0   : > { %v477_v63 = vadd.s32 %v476_v59, %v467_v54 }
  0xf1   : > { %v503_v2 = vadd.s32 1, %v499_v0 }
  0xf2   : > { %vm502_vm10 = vc.u32 %v477_v63, %v496_v60  ;;  %v501_v51 = vadd.s32 %v496_v60, %v477_v63 }
  0xf3   : > { %v504_v3 = vsel %vm502_vm10, %v503_v2, %v499_v0 }
  0xf4   : > { %v505_v4 = vadd.s32 %v504_v3, %v500_v1 }
  0xf6   : > { %v506_v6 = vadd.s32 536870912, %v505_v4 }
  0xf8   : > { %v507_v7 = vshrl.u32 %v506_v6, 30 }
  0xfa   : > { %v508_v8 = vshll.u32 %v507_v7, 30  ;;  %v531_v28 = vsub.s32 4, %v507_v7 }
  0xfc   : > { %v509_v9 = vsub.s32 %v505_v4, %v508_v8  ;;  %v532_v33 = vsel %vm409_vm13, %v531_v28, %v507_v7 }
  0xfd   : > { %v534_v36 = vsel %vm1411_vm14, 0, %v532_v33 }
  0xfe   : > { %vm510_vm11 = vcmp.lt.s32.totalorder %v509_v9, 0  ;;  %v511_v10 = vsub.s32 0, %v509_v9  ;;  %v551_v40 = vand.u32 3, %v534_v36 }
 0x100   : > { %v512_v11 = vsel %vm510_vm11, %v511_v10, %v509_v9  ;;  %vm556_vm15 = vcmp.eq.s32.totalorder %v551_v40, 2  ;;  %vm553_vm0 = vcmp.eq.s32.totalorder %v551_v40, 0  ;;  %vm552_vm1 = vcmp.lt.s32.totalorder %v551_v40, 2 }
 0x101   : > { %v513_v12 = vclz %v512_v11 }
 0x103   : > { %v853_v13 = vadd.s32 4294967294, %v513_v12 }
 0x105   : > { %vm854_vm12 = vcmp.lt.s32.totalorder %v853_v13, 0 }
 0x106   : > { %v516_v14 = vsel %vm854_vm12, 0, %v853_v13 }
 0x107   : > { %v517_v15 = vsub.s32 32, %v516_v14  ;;  %v518_v16 = vshll.u32 %v509_v9, %v516_v14  ;;  %v521_v17 = vsub.s32 4294967266, %v516_v14 }
 0x109   : > { %v519_v5 = vshrl.u32 %v501_v51, %v517_v15  ;;  %v522_v18 = vadd.s32 127, %v521_v17 }
 0x10b   : > { %v520_v19 = vor.u32 %v519_v5, %v518_v16  ;;  %v523_v20 = vshll.u32 %v522_v18, 23 }
 0x10d   : > { %v524_v21 = vor.u32 4788187, %v523_v20  ;;  %v527_v22 = vcvt.s32.f32 %v520_v19 }
 0x10f   : > { %v525_v23 = vand.u32 2147483647, %v524_v21 }
 0x111   : > { %v528_v24 = vmul.f32 %v527_v22, %v525_v23 }
 0x113   : > { %v529_v26 = vxor.u32 2147483648, %v528_v24 }
 0x115   : > { %v530_v27 = vsel %vm409_vm13, %v529_v26, %v528_v24 }
 0x116   : > { %v533_v29 = vsel %vm1411_vm14, %v1363_v41, %v530_v27 }
 0x117   : > { %v535_v30 = vmul.f32 %v533_v29, %v533_v29 }
 0x119   : > { %v536_v31 = vmul.f32 -0.001358992, %v535_v30  ;;  %v543_v32 = vmul.f32 -0.00019511016, %v535_v30 }
 0x11b   : > { %v537_v34 = vadd.f32 0.041655596, %v536_v31  ;;  %v544_v35 = vadd.f32 0.008332121, %v543_v32 }
 0x11d   : > { %v538_v44 = vmul.f32 %v537_v34, %v535_v30  ;;  %v545_v37 = vmul.f32 %v544_v35, %v535_v30 }
 0x11f   : > { %v539_v38 = vadd.f32 -0.4999988, %v538_v44  ;;  %v546_v39 = vadd.f32 -0.16666654, %v545_v37 }
 0x121   : > { %v540_v42 = vmul.f32 %v539_v38, %v535_v30  ;;  %v547_v43 = vmul.f32 %v546_v39, %v535_v30 }
 0x123   : > { %v541_v45 = vadd.f32 1.0, %v540_v42  ;;  %v548_v46 = vadd.f32 1.0, %v547_v43 }
 0x125   : > { %v549_v47 = vmul.f32 %v548_v46, %v533_v29  ;;  %v557_v48 = vxor.u32 2147483648, %v541_v45 }
 0x127   : > { %v554_v49 = vxor.u32 2147483648, %v549_v47  ;;  %v558_v50 = vsel %vm556_vm15, %v557_v48, %v549_v47 }
 0x129   : > { %v555_v52 = vsel %vm553_vm0, %v541_v45, %v554_v49 }
 0x12a   : > { %v559_v53 = vsel %vm552_vm1, %v555_v52, %v558_v50 }
 0x12b   : > { %v560_v54 = vsel %vm550_vm2, nan, %v559_v53 }
 0x12c   : > { %561 = vst [vmem:[%s1366_s17] sm:$0xff] %v560_v54 }
 0x12d PF: > { %p855_p4 = scmp.ne.s32.totalorder %s1163_s15, 1 }
 0x12f   : > { %565 = sbr.rel (%p855_p4) target bundleno = 405 (0x195), region = 44 }
 0x134   : > { %v569_v55 = vand.u32 2139095040, %v1363_v41  ;;  %v566_v57 = vand.u32 2147483647, %v1363_v41  ;;  %v1191_v2 = vmov 683565275   ;;  %vm568_vm15 = vcmp.lt.s32.totalorder %v1363_v41, 0 }
 0x135   : > { %v1192_v4 = vmov 2475754826   ;;  %v1193_v7 = vmov 2131351028   ;;  %v1194_v9 = vmov 2102212464  }
 0x136   : > { %v570_v56 = vshrl.u32 %v569_v55, 23  ;;  %v573_v60 = vand.u32 8388607, %v566_v57  ;;  %v1195_v11 = vmov 920167782   ;;  %v1197_v55 = vmov 0  }
 0x137   : > { %v1196_v16 = vmov 1326507024   ;;  %vm567_vm0 = vcmp.le.f32.partialorder %v566_v57, 0.7853982 }
 0x138   : > { %v856_v58 = vadd.s32 4294967169, %v570_v56  ;;  %v574_v63 = vor.u32 8388608, %v573_v60 }
 0x13a   : > { %v576_v59 = vadd.s32 1, %v856_v58  ;;  %v1430_v5 = vshll.u32 %v574_v63, 8 }
 0x13c   : > { %vm577_vm3 = vcmp.gt.s32.totalorder %v576_v59, 0  ;;  %v615_v29 = vand.u32 65535, %v1430_v5  ;;  %v616_v30 = vshrl.u32 %v1430_v5, 16 }
 0x13d   : > { %v578_v61 = vsel %vm577_vm3, %v576_v59, 0 }
 0x13e   : > { %v580_v62 = vand.u32 31, %v578_v61  ;;  %v1427_v0 = vshrl.u32 %v578_v61, 5 }
 0x140   : > { %v581_v1 = vsub.s32 32, %v580_v62  ;;  %v583_v3 = vshll.u32 %v1191_v2, %v580_v62  ;;  %v586_v6 = vshll.u32 %v1192_v4, %v580_v62  ;;  %v589_v8 = vshll.u32 %v1193_v7, %v580_v62 }
 0x141   : > { %v592_v10 = vshll.u32 %v1194_v9, %v580_v62  ;;  %v595_v12 = vshll.u32 %v1195_v11, %v580_v62  ;;  %vm598_vm4 = vcmp.lt.s32.totalorder %v1427_v0, 1  ;;  %vm601_vm5 = vcmp.lt.s32.totalorder %v1427_v0, 4 }
 0x142   : > { %v584_v13 = vshrl.u32 %v1192_v4, %v581_v1  ;;  %v587_v51 = vshrl.u32 %v1193_v7, %v581_v1  ;;  %v590_v14 = vshrl.u32 %v1194_v9, %v581_v1  ;;  %v593_v15 = vshrl.u32 %v1195_v11, %v581_v1 }
 0x143   : > { %v596_v17 = vshrl.u32 %v1196_v16, %v581_v1  ;;  %vm600_vm6 = vcmp.lt.s32.totalorder %v1427_v0, 3  ;;  %vm599_vm7 = vcmp.lt.s32.totalorder %v1427_v0, 2  ;;  %v582_v44 = vshrl.u32 %v1191_v2, %v581_v1 }
 0x144   : > { %v585_v18 = vor.u32 %v584_v13, %v583_v3  ;;  %v588_v19 = vor.u32 %v587_v51, %v586_v6  ;;  %v591_v20 = vor.u32 %v590_v14, %v589_v8  ;;  %v594_v21 = vor.u32 %v593_v15, %v592_v10 }
 0x145   : > { %v597_v22 = vor.u32 %v596_v17, %v595_v12 }
 0x146   : > { %v606_v23 = vsel %vm598_vm4, %v585_v18, %v588_v19  ;;  %v610_v24 = vsel %vm598_vm4, %v588_v19, %v591_v20  ;;  %v607_v25 = vsel %vm601_vm5, %v594_v21, 920167782  ;;  %v602_v52 = vsel %vm598_vm4, %v582_v44, %v585_v18 }
 0x147   : > { %v611_v26 = vsel %vm601_vm5, %v597_v22, 1326507024  ;;  %v608_v27 = vsel %vm600_vm6, %v591_v20, %v607_v25  ;;  %v603_v54 = vsel %vm601_vm5, %v591_v20, 2102212464  ;;  %vm709_vm4 = vweird.f32 %v1363_v41 }
 0x148   : > { %v612_v28 = vsel %vm600_vm6, %v594_v21, %v611_v26  ;;  %v609_v31 = vsel %vm599_vm7, %v606_v23, %v608_v27  ;;  %v604_v2 = vsel %vm600_vm6, %v588_v19, %v603_v54 }
 0x149   : > { %v613_v32 = vsel %vm599_vm7, %v610_v24, %v612_v28  ;;  %v639_v35 = vand.u32 65535, %v609_v31  ;;  %v640_v36 = vshrl.u32 %v609_v31, 16  ;;  %v605_v11 = vsel %vm599_vm7, %v602_v52, %v604_v2 }
 0x14a   : > { %v617_v33 = vand.u32 65535, %v613_v32  ;;  %v618_v34 = vshrl.u32 %v613_v32, 16  ;;  %v659_v14 = vmul.u32 %v1430_v5, %v605_v11 }
 0x14b   : > { %v641_v40 = vmul.u32 %v639_v35, %v615_v29  ;;  %v642_v42 = vmul.u32 %v640_v36, %v615_v29  ;;  %v643_v43 = vmul.u32 %v639_v35, %v616_v30  ;;  %v644_v48 = vmul.u32 %v640_v36, %v616_v30 }
 0x14c   : > { %v619_v37 = vmul.u32 %v617_v33, %v615_v29  ;;  %v620_v38 = vmul.u32 %v618_v34, %v615_v29  ;;  %v621_v39 = vmul.u32 %v617_v33, %v616_v30  ;;  %v622_v45 = vmul.u32 %v618_v34, %v616_v30 }
 0x14d   : > { %v645_v49 = vshll.u32 %v642_v42, 16  ;;  %v647_v50 = vshll.u32 %v643_v43, 16  ;;  %v646_v63 = vshrl.u32 %v642_v42, 16  ;;  %v648_v7 = vshrl.u32 %v643_v43, 16 }
 0x14e   : > { %v623_v46 = vshll.u32 %v620_v38, 16  ;;  %v625_v47 = vshll.u32 %v621_v39, 16  ;;  %v624_v59 = vshrl.u32 %v620_v38, 16  ;;  %v626_v3 = vshrl.u32 %v621_v39, 16 }
 0x14f   : > { %vm649_vm9 = vc.u32 %v641_v40, %v645_v49  ;;  %v651_v58 = vadd.s32 %v645_v49, %v641_v40 }
 0x150   : > { %vm627_vm8 = vc.u32 %v619_v37, %v623_v46  ;;  %v629_v53 = vadd.s32 %v623_v46, %v619_v37  ;;  %v650_v61 = vsel %vm649_vm9, 1, %v1197_v55 }
 0x151   : > { %v628_v56 = vsel %vm627_vm8, 1, %v1197_v55  ;;  %v652_v1 = vadd.s32 %v650_v61, %v644_v48  ;;  %vm653_vm11 = vc.u32 %v651_v58, %v647_v50  ;;  %v655_v10 = vadd.s32 %v651_v58, %v647_v50 }
 0x152   : > { %v630_v60 = vadd.s32 %v628_v56, %v622_v45  ;;  %vm631_vm10 = vc.u32 %v629_v53, %v625_v47  ;;  %v654_v6 = vsel %vm653_vm11, 1, %v1197_v55 }
 0x153   : > { %v632_v62 = vsel %vm631_vm10, 1, %v1197_v55  ;;  %v656_v8 = vadd.s32 %v654_v6, %v652_v1 }
 0x154   : > { %v634_v4 = vadd.s32 %v632_v62, %v630_v60 }
 0x155   : > { %v657_v12 = vadd.s32 %v656_v8, %v646_v63 }
 0x156   : > { %v635_v9 = vadd.s32 %v634_v4, %v624_v59 }
 0x157   : > { %v658_v51 = vadd.s32 %v657_v12, %v648_v7 }
 0x158   : > { %v636_v13 = vadd.s32 %v635_v9, %v626_v3 }
 0x159   : > { %v662_v15 = vadd.s32 1, %v658_v51 }
 0x15a   : > { %vm661_vm12 = vc.u32 %v636_v13, %v655_v10  ;;  %v660_v0 = vadd.s32 %v655_v10, %v636_v13 }
 0x15b   : > { %v663_v16 = vsel %vm661_vm12, %v662_v15, %v658_v51 }
 0x15c   : > { %v664_v17 = vadd.s32 %v663_v16, %v659_v14 }
 0x15e   : > { %v665_v18 = vadd.s32 536870912, %v664_v17 }
 0x160   : > { %v666_v19 = vshrl.u32 %v665_v18, 30 }
 0x162   : > { %v667_v20 = vshll.u32 %v666_v19, 30  ;;  %v690_v44 = vsub.s32 4, %v666_v19 }
 0x164   : > { %v668_v21 = vsub.s32 %v664_v17, %v667_v20  ;;  %v691_v39 = vsel %vm568_vm15, %v690_v44, %v666_v19 }
 0x165   : > { %v693_v43 = vsel %vm567_vm0, 0, %v691_v39 }
 0x166   : > { %vm669_vm13 = vcmp.lt.s32.totalorder %v668_v21, 0  ;;  %v670_v22 = vsub.s32 0, %v668_v21  ;;  %v710_v49 = vadd.s32 3, %v693_v43 }
 0x168   : > { %v671_v23 = vsel %vm669_vm13, %v670_v22, %v668_v21  ;;  %v711_v55 = vand.u32 3, %v710_v49 }
 0x169   : > { %v672_v24 = vclz %v671_v23 }
 0x16a   : > { %vm716_vm1 = vcmp.eq.s32.totalorder %v711_v55, 2  ;;  %vm713_vm2 = vcmp.eq.s32.totalorder %v711_v55, 0  ;;  %vm712_vm3 = vcmp.lt.s32.totalorder %v711_v55, 2 }
 0x16b   : > { %v857_v25 = vadd.s32 4294967294, %v672_v24 }
 0x16d   : > { %vm858_vm14 = vcmp.lt.s32.totalorder %v857_v25, 0 }
 0x16e   : > { %v675_v26 = vsel %vm858_vm14, 0, %v857_v25 }
 0x16f   : > { %v676_v27 = vsub.s32 32, %v675_v26  ;;  %v677_v28 = vshll.u32 %v668_v21, %v675_v26  ;;  %v680_v29 = vsub.s32 4294967266, %v675_v26 }
 0x171   : > { %v678_v5 = vshrl.u32 %v660_v0, %v676_v27  ;;  %v681_v30 = vadd.s32 127, %v680_v29 }
 0x173   : > { %v679_v31 = vor.u32 %v678_v5, %v677_v28  ;;  %v682_v32 = vshll.u32 %v681_v30, 23 }
 0x175   : > { %v683_v33 = vor.u32 4788187, %v682_v32  ;;  %v686_v34 = vcvt.s32.f32 %v679_v31 }
 0x177   : > { %v684_v35 = vand.u32 2147483647, %v683_v33 }
 0x179   : > { %v687_v36 = vmul.f32 %v686_v34, %v684_v35 }
 0x17b   : > { %v688_v37 = vxor.u32 2147483648, %v687_v36 }
 0x17d   : > { %v689_v38 = vsel %vm568_vm15, %v688_v37, %v687_v36 }
 0x17e   : > { %v692_v40 = vsel %vm567_vm0, %v1363_v41, %v689_v38 }
 0x17f   : > { %v694_v42 = vmul.f32 %v692_v40, %v692_v40 }
 0x181   : > { %v695_v45 = vmul.f32 -0.001358992, %v694_v42  ;;  %v702_v46 = vmul.f32 -0.00019511016, %v694_v42 }
 0x183   : > { %v696_v47 = vadd.f32 0.041655596, %v695_v45  ;;  %v703_v48 = vadd.f32 0.008332121, %v702_v46 }
 0x185   : > { %v697_v50 = vmul.f32 %v696_v47, %v694_v42  ;;  %v704_v52 = vmul.f32 %v703_v48, %v694_v42 }
 0x187   : > { %v698_v53 = vadd.f32 -0.4999988, %v697_v50  ;;  %v705_v54 = vadd.f32 -0.16666654, %v704_v52 }
 0x189   : > { %v699_v56 = vmul.f32 %v698_v53, %v694_v42  ;;  %v706_v57 = vmul.f32 %v705_v54, %v694_v42 }
 0x18b   : > { %v700_v58 = vadd.f32 1.0, %v699_v56  ;;  %v707_v59 = vadd.f32 1.0, %v706_v57 }
 0x18d   : > { %v708_v60 = vmul.f32 %v707_v59, %v692_v40  ;;  %v717_v61 = vxor.u32 2147483648, %v700_v58 }
 0x18f   : > { %v714_v62 = vxor.u32 2147483648, %v708_v60  ;;  %v718_v63 = vsel %vm716_vm1, %v717_v61, %v708_v60 }
 0x191   : > { %v715_v1 = vsel %vm713_vm2, %v700_v58, %v714_v62 }
 0x192   : > { %v719_v2 = vsel %vm712_vm3, %v715_v1, %v718_v63 }
 0x193   : > { %v720_v3 = vsel %vm709_vm4, nan, %v719_v2 }
 0x194   : > { %721 = vst [vmem:[%s1366_s17] sm:$0xff] %v720_v3 }
 0x195 PF: > { %s860_s18 = sshll.u32 %s1167_s16, 1  ;;  %s738_s5 = sshll.u32 %s1366_s17, 4  ;;  %s739_s5 = int_to_ptr.vmem [resolvable:$true] %s738_s5 }
 0x196   : > { %s734_s21 = sadd.s32 %s1163_s15, %s860_s18  ;;  %s723_s7 = scalar_lea.sflag [#allocation4], %s205_s26 }
 0x197   : > { %s861_s8 = sshll.u32 %s734_s21, 3  ;;  %s1073_s24 = scalar_lea.hbm %s1525_s2, 32 }
 0x198   : > { %s736_s29 = scalar_lea.hbm %s1525_s2, %s861_s8 }
 0x199   : > { %s740_s30 = sshll.u32 %s736_s29, 4  ;;  %s741_s30 = int_to_ptr.hbm [resolvable:$true] %s740_s30 }
 0x19a   : > { %s1067_s12 = sshra.s32 %s741_s30, 4  ;;  %s1068_s12 = int_to_ptr.hbm [resolvable:$true] %s1067_s12 }
 0x19b   : > { %s1069_s22 = scalar_lea.hbm %s1068_s12, 8  ;;  %p1074_p0 = scmp.lt.s32.totalorder %s1068_s12, %s1525_s2 }
 0x19c   : > { %p1070_p11 = scmp.ne.s32.totalorder %s1068_s12, %s1069_s22  ;;  %p1075_p3 = scmp.lt.s32.totalorder %s1073_s24, %s1069_s22 }
 0x19e   : > { %p1071_p12 = pnand %p1070_p11, %p1325_p7  ;;  %p1076_p5 = por %p1075_p3, %p1074_p0 }
 0x1a0   : > { %p1072_p13 = pneg %p1071_p12 }
 0x1a2   : > { %p1077_p6 = pnand %p1076_p5, %p1072_p13 }
 0x1a4   : > { %1080 = shalt.err (!%p1077_p6)
}
 0x1a5   : > { %870 = dma.vmem_to_hbm [thread:$0]  (%p1325_p7), %s739_s5, 128, %s741_s30, %s723_s7  }
 0x1a6 PF: > { %p887_p8 = scmp.ge.s32.totalorder %s1179_s19, 2  ;;  %s752_s23 = sand.u32 1, %s1139_s9  }
 0x1a7   : > { %s753_s26 = scalar_lea.sflag [#allocation4], %s752_s23 }
 0x1a8   : > { %p881_p9 = pnand %p887_p8, %p1338_p10 }
 0x1aa   : > { %p882_p2 = pneg %p881_p9 }
 0x1ac   : > { %1134 = dma.done.wait (%p882_p2), %s753_s26, 128  }
 0x1ad   : > { %1136 = vsyncadd (%p882_p2), %s753_s26, 4294967168  ;;  %s19_s19 = sadd.s32 1, %s1179_s19   ;;  %s1546_s25 = sld [smem:[#allocation15_spill]] }
 0x1ae   : > { %p16_p1 = scmp.ge.s32.totalorder %s19_s19, 6   ;;  %s1547_s15 = sld [smem:[#allocation11_spill]] }
 0x1af   : > { %s1548_s16 = sld [smem:[#allocation12_spill]]  ;;  %s1551_s9 = smov %s1143_s10 }
 0x1b0   : > { %s1549_s17 = sld [smem:[#allocation13_spill]]  ;;  %s1552_s10 = smov %s1147_s11 }
 0x1b1   : > { %s1550_s18 = sld [smem:[#allocation14_spill]]  ;;  %s1553_s11 = smov %s1333_s28 }
 0x1b2   : > { %s1554_s12 = smov %s1155_s13  ;;  %s1555_s13 = smov %s1159_s14 }
 0x1b3   : > { %s1556_s14 = smov %s1546_s25  ;;  %18 = sbr.rel (!%p16_p1) target bundleno = 12 (0xc), region = 86 }
 0x1b8   :  { %759 = vsyncpa [#allocation3], 1 }
 0x1b9   :  { %761 = vsyncpa [#allocation3 + $0x1], 1 }
 0x1ba   :  { %762 = vsyncpa [#allocation6], 1 }
 0x1bb   :  { %763 = vsyncpa [#allocation4], 1 }
 0x1bc   :  { %765 = vsyncpa [#allocation4 + $0x1], 1 }

</bundles_post_ra>
